<compile_context>
chip_gen: v7x
topology: tpu7x:2x2x1
jax: 0.10.0
libtpu: 0.0.40
codegen_flags: <defaults>
</compile_context>

<pallas_src>
import jax
import jax.numpy as jnp
from jax.experimental import pallas as pl
from jax.experimental.pallas import tpu as pltpu

BN_EPS = 1e-5
LANES = 128     # lane-dense head output width
SUBLANES = 8    # pad pooled-graph rows to a full sublane group


def cgcnn_kernel(x_ref, a_ref, mask_ref, w_ref, w2_ref, b_ref, out_ref):
    """Whole CGCNN forward (eval mode) on VMEM-resident operands.

    x_ref   : [N, F]      bf16  node features
    a_ref   : [N, N]      bf16  dense weighted adjacency, A[i, j] = e_{j->i}
    mask_ref: [Gp, N]     f32   one-hot graph mask (padded rows are zero)
    w_ref   : [2F+5H, H]  bf16  [Wrel1*s1; Wroot1*s1; Wrel2*s2; Wroot2*s2;
                                 Wrel3*s3; Wroot3*s3; Wl1 (cols >= 16 zero)]
    w2_ref  : [H, 128]    bf16  Wl2 tiled across 128 lanes, rows >= 16 zero
    b_ref   : [8, 128]    f32   rows 0-2: folded conv biases (lanes >= H zero),
                                 row 3: bl1 (lanes >= 16 zero), row 4: bl2 tiled
    out_ref : [Gp, 128]   f32   sigmoid(head); every lane carries the same value
    """
    f_in = x_ref.shape[1]
    h_dim = w2_ref.shape[0]

    a = a_ref[...]                                   # [N, N] bf16
    h = x_ref[...]                                   # [N, F] bf16

    def layer(h_b, c, row_off, b_row):
        # GraphConv + folded BN + ReLU:  relu((A h) Wrel*s + h Wroot*s + bias)
        agg = jnp.dot(a, h_b, preferred_element_type=jnp.float32)       # [N, c] f32
        w_rel = w_ref[row_off:row_off + c, :]                           # [c, H] bf16
        w_root = w_ref[row_off + c:row_off + 2 * c, :]                  # [c, H] bf16
        bias = b_ref[b_row:b_row + 1, 0:h_dim]                          # [1, H] f32
        out = (jnp.dot(agg.astype(jnp.bfloat16), w_rel,
                       preferred_element_type=jnp.float32)
               + jnp.dot(h_b, w_root, preferred_element_type=jnp.float32)
               + bias)
        return jnp.maximum(out, 0.0)                                    # [N, H] f32

    h = layer(h, f_in, 0, 0).astype(jnp.bfloat16)                       # conv1+bn1+relu
    h = layer(h, h_dim, 2 * f_in, 1).astype(jnp.bfloat16)               # conv2+bn2+relu
    h = layer(h, h_dim, 2 * f_in + 2 * h_dim, 2)                        # conv3+bn3+relu (f32)

    # global_max_pool: h >= 0 after the final ReLU, so masked-multiply + max is
    # exact.  If that ReLU is ever removed this must become a where(-inf) pool.
    mask = mask_ref[...]                                                # [Gp, N]
    pooled = jnp.max(mask[:, :, None] * h[None, :, :], axis=1)          # [Gp, H] f32

    # F.dropout(p=0.6) is the identity in eval mode.
    # TODO(synk): training-mode dropout would use pltpu.prng_seed/prng_random_bits.

    wl1 = w_ref[2 * f_in + 4 * h_dim:2 * f_in + 5 * h_dim, :]           # [H, H] bf16
    y = jnp.dot(pooled.astype(jnp.bfloat16), wl1,
                preferred_element_type=jnp.float32) + b_ref[3:4, 0:h_dim]
    y = jnp.maximum(y, 0.0)                                             # [Gp, H]; lanes>=16 are 0
    # Lane-dense head: Wl2 tiled to 128 lanes, rows >= 16 zero -> full-lane MXU
    # op and an unmasked, full-sublane-group store.
    y = jnp.dot(y.astype(jnp.bfloat16), w2_ref[...],
                preferred_element_type=jnp.float32) + b_ref[4:5, :]
    out_ref[...] = jax.nn.sigmoid(y)                                    # [Gp, 128] f32


def init_params(key, features_channels, hidden_channels):
    ks = jax.random.split(key, 16)
    f, h = features_channels, hidden_channels

    def u(k, shape, fan_in):
        bound = 1.0 / jnp.sqrt(jnp.float32(fan_in))
        return jax.random.uniform(k, shape, jnp.float32, -bound, bound)

    p = {}
    # GraphConv 1 (F -> H), 2 & 3 (H -> H): lin_rel has bias, lin_root has none.
    p["wrel1"], p["wroot1"], p["brel1"] = u(ks[0], (f, h), f), u(ks[1], (f, h), f), u(ks[2], (1, h), f)
    p["wrel2"], p["wroot2"], p["brel2"] = u(ks[3], (h, h), h), u(ks[4], (h, h), h), u(ks[5], (1, h), h)
    p["wrel3"], p["wroot3"], p["brel3"] = u(ks[6], (h, h), h), u(ks[7], (h, h), h), u(ks[8], (1, h), h)
    # BatchNorm1d defaults: gamma=1, beta=0, running_mean=0, running_var=1 (eval).
    for i in (1, 2, 3):
        p[f"g{i}"] = jnp.ones((1, h), jnp.float32)
        p[f"b{i}"] = jnp.zeros((1, h), jnp.float32)
        p[f"m{i}"] = jnp.zeros((1, h), jnp.float32)
        p[f"v{i}"] = jnp.ones((1, h), jnp.float32)
    # Head: Linear(H, 16), Linear(16, 1)
    p["wl1"], p["bl1"] = u(ks[9], (h, 16), h), u(ks[10], (1, 16), h)
    p["wl2"], p["bl2"] = u(ks[11], (16, 1), 16), u(ks[12], (1, 1), 16)
    return p


def cgcnn_forward(x, edge_index, edge_attr, batch, params, num_graphs):
    n, f = x.shape
    h_dim = params["wrel2"].shape[0]
    assert h_dim >= 16, "weight packing assumes hidden_channels >= 16"

    # Dense weighted adjacency A[dst, src] += e (messages flow src -> dst).
    src, dst = edge_index[0], edge_index[1]
    a = jnp.zeros((n, n), jnp.float32).at[dst, src].add(edge_attr.astype(jnp.float32))

    # One-hot pooling mask, padded to a full sublane group of graph rows.
    g_pad = ((num_graphs + SUBLANES - 1) // SUBLANES) * SUBLANES
    mask = (batch[None, :] == jnp.arange(g_pad, dtype=jnp.int32)[:, None]).astype(jnp.float32)

    # Fold eval-mode BN into each GraphConv (scale columns, fold mean/beta into bias).
    def fold(i):
        s = params[f"g{i}"] * jax.lax.rsqrt(params[f"v{i}"] + BN_EPS)       # [1, H]
        w_rel = params[f"wrel{i}"] * s
        w_root = params[f"wroot{i}"] * s
        bias = params[f"brel{i}"] * s + (params[f"b{i}"] - params[f"m{i}"] * s)
        return w_rel, w_root, bias

    wr1, wo1, b1 = fold(1)
    wr2, wo2, b2 = fold(2)
    wr3, wo3, b3 = fold(3)

    # Weight slab 1: all conv weights + lin1 (cols padded to H), lanes = H.
    wl1_pad = jnp.pad(params["wl1"], ((0, 0), (0, h_dim - 16)))             # [H, H]
    w_slab = jnp.concatenate([wr1, wo1, wr2, wo2, wr3, wo3, wl1_pad],
                             axis=0).astype(jnp.bfloat16)                   # [2F+5H, H]

    # Weight slab 2: lin2 tiled to 128 lanes; rows >= 16 zero so it can consume
    # the H-lane relu(lin1) output directly.
    w2_slab = jnp.zeros((h_dim, LANES), jnp.float32)
    w2_slab = w2_slab.at[:16, :].set(jnp.tile(params["wl2"], (1, LANES)))
    w2_slab = w2_slab.astype(jnp.bfloat16)                                  # [H, 128]

    # Bias slab (f32, one full vreg): conv biases, bl1, bl2-tiled.
    b_slab = jnp.zeros((SUBLANES, LANES), jnp.float32)
    b_slab = b_slab.at[0, :h_dim].set(b1[0])
    b_slab = b_slab.at[1, :h_dim].set(b2[0])
    b_slab = b_slab.at[2, :h_dim].set(b3[0])
    b_slab = b_slab.at[3, :16].set(params["bl1"][0])
    b_slab = b_slab.at[4, :].set(jnp.tile(params["bl2"], (1, LANES))[0])

    args = (x.astype(jnp.bfloat16), a.astype(jnp.bfloat16), mask,
            w_slab, w2_slab, b_slab)

    out_shape = jax.ShapeDtypeStruct((g_pad, LANES), jnp.float32)
    in_bytes = sum(int(v.size) * int(v.dtype.itemsize) for v in args)
    out_bytes = g_pad * LANES * 4
    # Explicit VMEM budget: footprint (inputs + output + intermediates) with
    # headroom; identical across v5e/v6e/v7x default-limit differences.
    vmem_limit = int(min(64 << 20, 4 * (in_bytes + out_bytes) + (4 << 20)))

    flops = 2 * (n * n * f + 2 * n * f * h_dim                    # layer 1
                 + 2 * (n * n * h_dim + 2 * n * h_dim * h_dim)    # layers 2, 3
                 + g_pad * h_dim * h_dim + g_pad * h_dim * LANES)  # head
    cost = pl.CostEstimate(flops=int(flops),
                           transcendentals=int(g_pad * LANES),
                           bytes_accessed=int(in_bytes + out_bytes))

    vmem = pl.BlockSpec(memory_space=pltpu.MemorySpace.VMEM)
    out = pl.pallas_call(
        cgcnn_kernel,
        out_shape=out_shape,
        in_specs=[vmem] * len(args),
        out_specs=vmem,
        compiler_params=pltpu.CompilerParams(vmem_limit_bytes=vmem_limit),
        cost_estimate=cost,
    )(*args)
    # Padded graph rows are discarded; all 128 lanes carry the same head value.
    return out[:num_graphs, :1]


def cgcnn_reference(x, edge_index, edge_attr, batch, params, num_graphs):
    """Pure-JAX f32 reference (eval mode) for tolerance checking."""
    n = x.shape[0]
    src, dst = edge_index[0], edge_index[1]
    a = jnp.zeros((n, n), jnp.float32).at[dst, src].add(edge_attr.astype(jnp.float32))

    def conv_bn_relu(h, i):
        agg = a @ h
        out = agg @ params[f"wrel{i}"] + params[f"brel{i}"] + h @ params[f"wroot{i}"]
        s = params[f"g{i}"] * jax.lax.rsqrt(params[f"v{i}"] + BN_EPS)
        out = (out - params[f"m{i}"]) * s + params[f"b{i}"]
        return jnp.maximum(out, 0.0)

    h = conv_bn_relu(x.astype(jnp.float32), 1)
    h = conv_bn_relu(h, 2)
    h = conv_bn_relu(h, 3)
    onehot = batch[None, :] == jnp.arange(num_graphs)[:, None]
    pooled = jnp.max(jnp.where(onehot[:, :, None], h[None, :, :], -jnp.inf), axis=1)
    y = jnp.maximum(pooled @ params["wl1"] + params["bl1"], 0.0)
    return jax.nn.sigmoid(y @ params["wl2"] + params["bl2"])


if __name__ == "__main__":
    key = jax.random.PRNGKey(0)
    k_param, k_x, k_src, k_dst, k_e = jax.random.split(key, 5)

    N, F, H, G, E = 16, 8, 32, 2, 40  # nodes, feature ch, hidden ch, graphs, edges

    x = jax.random.normal(k_x, (N, F), jnp.float32)
    src = jax.random.randint(k_src, (E,), 0, N, jnp.int32)
    dst = jax.random.randint(k_dst, (E,), 0, N, jnp.int32)
    edge_index = jnp.stack([src, dst], axis=0)                        # [2, E]
    edge_attr = jax.random.uniform(k_e, (E,), jnp.float32, 0.1, 1.0)  # edge weights
    batch = jnp.concatenate([jnp.zeros((N // 2,), jnp.int32),
                             jnp.ones((N - N // 2,), jnp.int32)])     # [N]

    params = init_params(k_param, F, H)

    out = cgcnn_forward(x, edge_index, edge_attr, batch, params, num_graphs=G)
    out = jax.block_until_ready(out)
    assert out.shape == (G, 1)
    assert bool(jnp.all(jnp.isfinite(out))) and bool(jnp.all((out >= 0) & (out <= 1)))

    ref = cgcnn_reference(x, edge_index, edge_attr, batch, params, num_graphs=G)
    # bf16 matmul operands with f32 accumulation: tolerance stated explicitly.
    assert bool(jnp.allclose(out, ref, atol=3e-2, rtol=3e-2)), (out, ref)

    print("KERNEL_OK")
</pallas_src>

<mosaic_0001>
module attributes {stable_mosaic.version = 11 : i64} {
  func.func @cgcnn_kernel(%arg0: memref<16x8xbf16, #tpu.memory_space<vmem>>, %arg1: memref<16x16xbf16, #tpu.memory_space<vmem>>, %arg2: memref<8x16xf32, #tpu.memory_space<vmem>>, %arg3: memref<176x32xbf16, #tpu.memory_space<vmem>>, %arg4: memref<32x128xbf16, #tpu.memory_space<vmem>>, %arg5: memref<8x128xf32, #tpu.memory_space<vmem>>, %arg6: memref<8x128xf32, #tpu.memory_space<vmem>>) attributes {dimension_semantics = [], scalar_prefetch = 0 : i64, scratch_operands = 0 : i64, tpu.core_type = #tpu.core_type<tc>} {
    %c0 = arith.constant 0 : index
    %c0_0 = arith.constant 0 : index
    %0 = vector.load %arg1[%c0, %c0_0] : memref<16x16xbf16, #tpu.memory_space<vmem>>, vector<16x16xbf16>
    %c0_1 = arith.constant 0 : index
    %c0_2 = arith.constant 0 : index
    %1 = vector.load %arg0[%c0_1, %c0_2] : memref<16x8xbf16, #tpu.memory_space<vmem>>, vector<16x8xbf16>
    %cst = arith.constant dense<0.000000e+00> : vector<16x8xf32>
    %2 = tpu.matmul %0, %1, %cst {dimension_numbers = #tpu.dot_dimension_numbers<[1], [0], [0], [1], [0, 0, 1, 1], [], []>} : vector<16x16xbf16>, vector<16x8xbf16>, vector<16x8xf32> -> vector<16x8xf32>
    %c0_3 = arith.constant 0 : index
    %c0_4 = arith.constant 0 : index
    %3 = vector.load %arg3[%c0_3, %c0_4] : memref<176x32xbf16, #tpu.memory_space<vmem>>, vector<8x32xbf16>
    %c8 = arith.constant 8 : index
    %c0_5 = arith.constant 0 : index
    %4 = vector.load %arg3[%c8, %c0_5] : memref<176x32xbf16, #tpu.memory_space<vmem>>, vector<8x32xbf16>
    %c0_6 = arith.constant 0 : index
    %c0_7 = arith.constant 0 : index
    %5 = vector.load %arg5[%c0_6, %c0_7] : memref<8x128xf32, #tpu.memory_space<vmem>>, vector<1x32xf32>
    %6 = arith.truncf %2 : vector<16x8xf32> to vector<16x8xbf16>
    %cst_8 = arith.constant dense<0.000000e+00> : vector<16x32xf32>
    %7 = tpu.matmul %6, %3, %cst_8 {dimension_numbers = #tpu.dot_dimension_numbers<[1], [0], [0], [1], [0, 0, 1, 1], [], []>} : vector<16x8xbf16>, vector<8x32xbf16>, vector<16x32xf32> -> vector<16x32xf32>
    %cst_9 = arith.constant dense<0.000000e+00> : vector<16x32xf32>
    %8 = tpu.matmul %1, %4, %cst_9 {dimension_numbers = #tpu.dot_dimension_numbers<[1], [0], [0], [1], [0, 0, 1, 1], [], []>} : vector<16x8xbf16>, vector<8x32xbf16>, vector<16x32xf32> -> vector<16x32xf32>
    %9 = arith.addf %7, %8 : vector<16x32xf32>
    %10 = vector.broadcast %5 : vector<1x32xf32> to vector<16x32xf32>
    %11 = arith.addf %9, %10 : vector<16x32xf32>
    %cst_10 = arith.constant 0.000000e+00 : f32
    %12 = vector.broadcast %cst_10 : f32 to vector<16x32xf32>
    %13 = arith.maximumf %11, %12 : vector<16x32xf32>
    %14 = arith.truncf %13 : vector<16x32xf32> to vector<16x32xbf16>
    %cst_11 = arith.constant dense<0.000000e+00> : vector<16x32xf32>
    %15 = tpu.matmul %0, %14, %cst_11 {dimension_numbers = #tpu.dot_dimension_numbers<[1], [0], [0], [1], [0, 0, 1, 1], [], []>} : vector<16x16xbf16>, vector<16x32xbf16>, vector<16x32xf32> -> vector<16x32xf32>
    %c16 = arith.constant 16 : index
    %c0_12 = arith.constant 0 : index
    %16 = vector.load %arg3[%c16, %c0_12] : memref<176x32xbf16, #tpu.memory_space<vmem>>, vector<32x32xbf16>
    %c48 = arith.constant 48 : index
    %c0_13 = arith.constant 0 : index
    %17 = vector.load %arg3[%c48, %c0_13] : memref<176x32xbf16, #tpu.memory_space<vmem>>, vector<32x32xbf16>
    %c1 = arith.constant 1 : index
    %c0_14 = arith.constant 0 : index
    %18 = vector.load %arg5[%c1, %c0_14] : memref<8x128xf32, #tpu.memory_space<vmem>>, vector<1x32xf32>
    %19 = arith.truncf %15 : vector<16x32xf32> to vector<16x32xbf16>
    %cst_15 = arith.constant dense<0.000000e+00> : vector<16x32xf32>
    %20 = tpu.matmul %19, %16, %cst_15 {dimension_numbers = #tpu.dot_dimension_numbers<[1], [0], [0], [1], [0, 0, 1, 1], [], []>} : vector<16x32xbf16>, vector<32x32xbf16>, vector<16x32xf32> -> vector<16x32xf32>
    %cst_16 = arith.constant dense<0.000000e+00> : vector<16x32xf32>
    %21 = tpu.matmul %14, %17, %cst_16 {dimension_numbers = #tpu.dot_dimension_numbers<[1], [0], [0], [1], [0, 0, 1, 1], [], []>} : vector<16x32xbf16>, vector<32x32xbf16>, vector<16x32xf32> -> vector<16x32xf32>
    %22 = arith.addf %20, %21 : vector<16x32xf32>
    %23 = vector.broadcast %18 : vector<1x32xf32> to vector<16x32xf32>
    %24 = arith.addf %22, %23 : vector<16x32xf32>
    %cst_17 = arith.constant 0.000000e+00 : f32
    %25 = vector.broadcast %cst_17 : f32 to vector<16x32xf32>
    %26 = arith.maximumf %24, %25 : vector<16x32xf32>
    %27 = arith.truncf %26 : vector<16x32xf32> to vector<16x32xbf16>
    %cst_18 = arith.constant dense<0.000000e+00> : vector<16x32xf32>
    %28 = tpu.matmul %0, %27, %cst_18 {dimension_numbers = #tpu.dot_dimension_numbers<[1], [0], [0], [1], [0, 0, 1, 1], [], []>} : vector<16x16xbf16>, vector<16x32xbf16>, vector<16x32xf32> -> vector<16x32xf32>
    %c80 = arith.constant 80 : index
    %c0_19 = arith.constant 0 : index
    %29 = vector.load %arg3[%c80, %c0_19] : memref<176x32xbf16, #tpu.memory_space<vmem>>, vector<32x32xbf16>
    %c112 = arith.constant 112 : index
    %c0_20 = arith.constant 0 : index
    %30 = vector.load %arg3[%c112, %c0_20] : memref<176x32xbf16, #tpu.memory_space<vmem>>, vector<32x32xbf16>
    %c2 = arith.constant 2 : index
    %c0_21 = arith.constant 0 : index
    %31 = vector.load %arg5[%c2, %c0_21] : memref<8x128xf32, #tpu.memory_space<vmem>>, vector<1x32xf32>
    %32 = arith.truncf %28 : vector<16x32xf32> to vector<16x32xbf16>
    %cst_22 = arith.constant dense<0.000000e+00> : vector<16x32xf32>
    %33 = tpu.matmul %32, %29, %cst_22 {dimension_numbers = #tpu.dot_dimension_numbers<[1], [0], [0], [1], [0, 0, 1, 1], [], []>} : vector<16x32xbf16>, vector<32x32xbf16>, vector<16x32xf32> -> vector<16x32xf32>
    %cst_23 = arith.constant dense<0.000000e+00> : vector<16x32xf32>
    %34 = tpu.matmul %27, %30, %cst_23 {dimension_numbers = #tpu.dot_dimension_numbers<[1], [0], [0], [1], [0, 0, 1, 1], [], []>} : vector<16x32xbf16>, vector<32x32xbf16>, vector<16x32xf32> -> vector<16x32xf32>
    %35 = arith.addf %33, %34 : vector<16x32xf32>
    %36 = vector.broadcast %31 : vector<1x32xf32> to vector<16x32xf32>
    %37 = arith.addf %35, %36 : vector<16x32xf32>
    %cst_24 = arith.constant 0.000000e+00 : f32
    %38 = vector.broadcast %cst_24 : f32 to vector<16x32xf32>
    %39 = arith.maximumf %37, %38 : vector<16x32xf32>
    %c0_25 = arith.constant 0 : index
    %c0_26 = arith.constant 0 : index
    %40 = vector.load %arg2[%c0_25, %c0_26] : memref<8x16xf32, #tpu.memory_space<vmem>>, vector<8x16xf32>
    %41 = vector.shape_cast %40 : vector<8x16xf32> to vector<8x16x1xf32>
    %42 = vector.shape_cast %39 : vector<16x32xf32> to vector<1x16x32xf32>
    %43 = vector.broadcast %41 : vector<8x16x1xf32> to vector<8x16x32xf32>
    %44 = vector.broadcast %42 : vector<1x16x32xf32> to vector<8x16x32xf32>
    %45 = arith.mulf %43, %44 : vector<8x16x32xf32>
    %cst_27 = arith.constant dense<0xFF800000> : vector<8x32xf32>
    %46 = vector.multi_reduction <maximumf>, %45, %cst_27 [1] : vector<8x16x32xf32> to vector<8x32xf32>
    %c144 = arith.constant 144 : index
    %c0_28 = arith.constant 0 : index
    %47 = vector.load %arg3[%c144, %c0_28] : memref<176x32xbf16, #tpu.memory_space<vmem>>, vector<32x32xbf16>
    %48 = arith.truncf %46 : vector<8x32xf32> to vector<8x32xbf16>
    %cst_29 = arith.constant dense<0.000000e+00> : vector<8x32xf32>
    %49 = tpu.matmul %48, %47, %cst_29 {dimension_numbers = #tpu.dot_dimension_numbers<[1], [0], [0], [1], [0, 0, 1, 1], [], []>} : vector<8x32xbf16>, vector<32x32xbf16>, vector<8x32xf32> -> vector<8x32xf32>
    %c3 = arith.constant 3 : index
    %c0_30 = arith.constant 0 : index
    %50 = vector.load %arg5[%c3, %c0_30] : memref<8x128xf32, #tpu.memory_space<vmem>>, vector<1x32xf32>
    %51 = vector.broadcast %50 : vector<1x32xf32> to vector<8x32xf32>
    %52 = arith.addf %49, %51 : vector<8x32xf32>
    %cst_31 = arith.constant 0.000000e+00 : f32
    %53 = vector.broadcast %cst_31 : f32 to vector<8x32xf32>
    %54 = arith.maximumf %52, %53 : vector<8x32xf32>
    %55 = arith.truncf %54 : vector<8x32xf32> to vector<8x32xbf16>
    %c0_32 = arith.constant 0 : index
    %c0_33 = arith.constant 0 : index
    %56 = vector.load %arg4[%c0_32, %c0_33] : memref<32x128xbf16, #tpu.memory_space<vmem>>, vector<32x128xbf16>
    %cst_34 = arith.constant dense<0.000000e+00> : vector<8x128xf32>
    %57 = tpu.matmul %55, %56, %cst_34 {dimension_numbers = #tpu.dot_dimension_numbers<[1], [0], [0], [1], [0, 0, 1, 1], [], []>} : vector<8x32xbf16>, vector<32x128xbf16>, vector<8x128xf32> -> vector<8x128xf32>
    %c4 = arith.constant 4 : index
    %c0_35 = arith.constant 0 : index
    %58 = vector.load %arg5[%c4, %c0_35] : memref<8x128xf32, #tpu.memory_space<vmem>>, vector<1x128xf32>
    %59 = vector.broadcast %58 : vector<1x128xf32> to vector<8x128xf32>
    %60 = arith.addf %57, %59 : vector<8x128xf32>
    %61 = arith.negf %60 : vector<8x128xf32>
    %62 = math.exp %61 : vector<8x128xf32>
    %cst_36 = arith.constant 1.000000e+00 : f32
    %63 = vector.broadcast %cst_36 : f32 to vector<8x128xf32>
    %64 = arith.addf %63, %62 : vector<8x128xf32>
    %65 = arith.divf %63, %64 : vector<8x128xf32>
    %c0_37 = arith.constant 0 : index
    %c0_38 = arith.constant 0 : index
    %66 = vector.load %arg6[%c0_37, %c0_38] : memref<8x128xf32, #tpu.memory_space<vmem>>, vector<8x128xf32>
    tpu.vector_store %arg6[%c0_37, %c0_38], %65 {strides = array<i32>} : memref<8x128xf32, #tpu.memory_space<vmem>>, vector<8x128xf32>,
    return
  }
}

</mosaic_0001>

<bundles_post_ra>
// kernel: tpu_custom_call.1
= control target key start
LH: loop header
LB: loop body
LE: loop exit
PB: predicated region body
PF: predicated region fallthrough
CT: control target
= control target key end

     0   :  { %v1087_v1 = vmov 0.0   ;;  %vm1088_vm0 = vmmov 0   ;;  %vm40_vm1 = vcmask 130048   ;;  %vm93_vm2 = vcmask 1043456   ;;  %s1273_s0 = inlined_call_operand.vmem [shape: bf16[16,8], index: 0, kind: input, shape index: {}]   ;;  %s1274_s1 = inlined_call_operand.vmem [shape: bf16[16,16], index: 1, kind: input, shape index: {}]   ;;  %s1275_s2 = inlined_call_operand.vmem [shape: f32[8,16], index: 2, kind: input, shape index: {}]   ;;  %s1276_s3 = inlined_call_operand.vmem [shape: bf16[176,32], index: 3, kind: input, shape index: {}]   ;;  %s1277_s4 = inlined_call_operand.vmem [shape: bf16[32,128], index: 4, kind: input, shape index: {}]   ;;  %s1278_s5 = inlined_call_operand.vmem [shape: f32[8,128], index: 5, kind: input, shape index: {}]   ;;  %s1279_s6 = inlined_call_operand.hbm [shape: f32[8,128], index: 6, kind: output, shape index: {}]  }
   0x1   :  { %v1045_v0 = vld [vmem:[%s1273_s0] sm:$0xff]   ;;  %964 = vmatprep.subr.bf16.mxu0 %v1087_v1  ;;  %970 = vmatprep.subr.bf16.mxu1 %v1087_v1 }
   0x2   :  { %v1132_v2 = vld [vmem:[%s1274_s1] sm:$0xff]   ;;  %965 = vmatpush3.bf16.msra.mxu0 %v1045_v0  ;;  %966 = vmatprep.mubr.msk.bf16.mxu0 %vm1088_vm0, %v1087_v1 }
   0x3   :  { %v85_v3 = vld [vmem:[%s1276_s3] sm:$0xf]  ;;  %v86_v4 = vld [vmem:[%s1276_s3 + $0x4] sm:$0xf]  ;;  %972 = vmatprep.mubr.msk.bf16.mxu1 %vm1088_vm0, %v1087_v1  ;;  %976 = vmatprep.subr.bf16.mxu0 %v1087_v1 }
   0x4   :  { %v95_v5 = vsel %vm93_vm2, %v86_v4, 0  ;;  %v142_v6 = vsel %vm93_vm2, %v85_v3, 0 }
   0x5   :  { %971 = vmatpush3.bf16.msra.mxu1 %v95_v5  ;;  %967 = vmatmul.mubr.msk.bf16.vlgmr.msra.gmra.mrb[0].mxu0 %vm40_vm1, %v1132_v2 }
   0x6   :  { %982 = vmatprep.subr.bf16.mxu1 %v1087_v1  ;;  %977 = vmatpush3.bf16.msra.mxu0 %v142_v6 }
   0x7   :  { %978 = vmatprep.mubr.msk.bf16.mxu0 %vm1088_vm0, %v1087_v1  ;;  %988 = vmatprep.subr.bf16.mxu0 %v1087_v1 }
   0x8   :  { %11 = vsyncpa [#allocation3], 0  ;;  %vm89_vm3 = vcmask 64512   ;;  %v1047_v16 = vld [vmem:[%s1276_s3 + $0x18] sm:$0xff]   ;;  %v1048_v17 = vld [vmem:[%s1276_s3 + $0x20] sm:$0xff]   ;;  %vm257_vm4 = vcmask 261120   ;;  %v539_v57 = vlaneseq }
   0x9   :  { %973 = vmatmul.mubr.msk.bf16.vlgmr.msra.gmra.mrb[0].mxu1 %vm89_vm3, %v1045_v0  ;;  %v910_v18 = vld [vmem:[%s1278_s5] ss:$0 sm:$0xff]  ;;  %v1049_v30 = vld [vmem:[%s1276_s3 + $0x8] sm:$0xff]   ;;  %v1050_v31 = vld [vmem:[%s1276_s3 + $0x10] sm:$0xff]   ;;  %vm748_vm5 = vcmask 1041409   ;;  %vm750_vm6 = vcmask 1042434  }
   0xa   :  { %984 = vmatprep.mubr.msk.bf16.mxu1 %vm1088_vm0, %v1087_v1  ;;  %v1051_v41 = vld [vmem:[%s1276_s3 + $0x38] sm:$0xff]   ;;  %v1052_v42 = vld [vmem:[%s1276_s3 + $0x40] sm:$0xff]   ;;  %v1053_v55 = vld [vmem:[%s1276_s3 + $0x28] sm:$0xff]   ;;  %v540_v58 = vshrl.u32 %v539_v57, 7  ;;  %vm752_vm7 = vcmask 1043459   ;;  %vm754_vm8 = vcmask 1044484  }
   0xb   :  { %v918_v43 = vld [vmem:[%s1278_s5 + $0x1] ss:$0 sm:$0xff]  ;;  %v1054_v56 = vld [vmem:[%s1276_s3 + $0x30] sm:$0xff]   ;;  %vm756_vm9 = vcmask 1045509   ;;  %vm758_vm10 = vcmask 1046534   ;;  %vm760_vm11 = vcmask 1047559  }
   0xc   :  { %v538_v59 = vld [vmem:[%s1275_s2] sm:$0xff]  ;;  %v541_v60 = vsub.s32 0, %v540_v58  ;;  %v552_v61 = vsub.s32 1, %v540_v58  ;;  %v563_v0 = vsub.s32 2, %v540_v58  ;;  %v574_v3 = vsub.s32 3, %v540_v58 }
   0xd   :  { %v585_v5 = vsub.s32 4, %v540_v58 }
   0xe   :  { %v542_v62 = vrot.slane %v538_v59, %v541_v60  ;;  %v553_v63 = vrot.slane %v538_v59, %v552_v61  ;;  %v575_v4 = vrot.slane %v538_v59, %v574_v3 }
   0xf   :  { %v586_v6 = vrot.slane %v538_v59, %v585_v5 }
  0x10   :  { %544 = vbcast.lane.b32.xlu0 %v542_v62, 256  ;;  %555 = vbcast.lane.b32.xlu1 %v553_v63, 256 }
  0x14   :  { %548 = vbcast.lane.b32.xlu0 %v542_v62, 264  ;;  %559 = vbcast.lane.b32.xlu1 %v553_v63, 264 }
  0xd8   :  { %v78_v7 = vpop.f32.mrb[0].mxu0 }
  0xd9   :  { %v968_v8 = vpop.f32.mrb[1].mxu0 }
  0xda   :  { %v81_v9 = vpop.f32.mrb[2].mxu0 }
  0xdb   :  { %v88_v10 = vpack.c.bf16 %v81_v9, %v78_v7  ;;  %v969_v11 = vpop.f32.mrb[3].mxu0  ;;  %v596_v7 = vsub.s32 5, %v540_v58  ;;  %v607_v9 = vsub.s32 6, %v540_v58 }
  0xdc   :  { %v131_v12 = vpop.f32.mrb[0].mxu1  ;;  %v618_v11 = vsub.s32 7, %v540_v58 }
  0xdd   :  { %979 = vmatmul.mubr.msk.bf16.vlgmr.msra.gmra.mrb[4].mxu0 %vm89_vm3, %v88_v10  ;;  %v974_v13 = vpop.f32.mrb[1].mxu1  ;;  %v597_v8 = vrot.slane %v538_v59, %v596_v7  ;;  %v608_v10 = vrot.slane %v538_v59, %v607_v9 }
  0xde   :  { %992 = vmatprep.mubr.msk.bf16.mxu0 %vm1088_vm0, %v1087_v1  ;;  %v134_v14 = vpop.f32.mrb[2].mxu1  ;;  %989 = vmatpush3.bf16.msra.mxu0 %v1047_v16 }
  0xdf   :  { %v975_v15 = vpop.f32.mrb[3].mxu1  ;;  %990 = vmatprep.subr.bf16.mxu0 %v1087_v1 }
  0xe2   :  { %991 = vmatpush3.bf16.msra.mxu0 %v1048_v17 }
  0xe3   :  { %1004 = vmatprep.subr.bf16.mxu0 %v1087_v1 }
 0x1b0   :  { %v178_v19 = vpop.f32.mrb[4].mxu0 }
 0x1b1   :  { %v179_v20 = vadd.f32 %v178_v19, %v131_v12  ;;  %v980_v21 = vpop.f32.mrb[5].mxu0  ;;  %v619_v12 = vrot.slane %v538_v59, %v618_v11 }
 0x1b2   :  { %v181_v22 = vpop.f32.mrb[6].mxu0 }
 0x1b3   :  { %v189_v23 = vadd.f32 %v910_v18, %v179_v20  ;;  %v182_v24 = vadd.f32 %v181_v22, %v134_v14  ;;  %v981_v25 = vpop.f32.mrb[7].mxu0  ;;  %v1055_v22 = vld [vmem:[%s1276_s3 + $0x48] sm:$0xff]  }
 0x1b4   :  { %v556_v25 = vpop.permute.xlu1 %555 }
 0x1b5   :  { %v190_v26 = vadd.f32 %v910_v18, %v182_v24  ;;  %v191_v27 = vmax.f32 %v189_v23, 0.0  ;;  %v1056_v23 = vld [vmem:[%s1276_s3 + $0x50] sm:$0xff]   ;;  %v545_v24 = vpop.permute.xlu0 %544 }
 0x1b7   :  { %v192_v28 = vmax.f32 %v190_v26, 0.0 }
 0x1b9   :  { %v193_v29 = vpack.c.bf16 %v192_v28, %v191_v27  ;;  %v549_v26 = vpop.permute.xlu0 %548  ;;  %v560_v27 = vpop.permute.xlu1 %559 }
 0x1bb   :  { %983 = vmatpush3.bf16.msra.mxu1 %v193_v29  ;;  %993 = vmatmul.mubr.msk.bf16.vlgmr.msra.gmra.mrb[8].mxu0 %vm257_vm4, %v193_v29 }
 0x1bc   :  { %996 = vmatprep.subr.bf16.mxu1 %v1087_v1  ;;  %1006 = vmatprep.mubr.msk.bf16.mxu0 %vm1088_vm0, %v1087_v1 }
 0x1be   :  { %985 = vmatmul.mubr.msk.bf16.vlgmr.msra.gmra.mrb[4].mxu1 %vm40_vm1, %v1132_v2 }
 0x1bf   :  { %1000 = vmatprep.mubr.msk.bf16.mxu1 %vm1088_vm0, %v1087_v1  ;;  %997 = vmatpush3.bf16.msra.mxu1 %v1049_v30 }
 0x1c0   :  { %998 = vmatprep.subr.bf16.mxu1 %v1087_v1 }
 0x1c3   :  { %999 = vmatpush3.bf16.msra.mxu1 %v1050_v31 }
 0x1c4   :  { %1010 = vmatprep.subr.bf16.mxu1 %v1087_v1 }
 0x28e   :  { %v295_v32 = vpop.f32.mrb[8].mxu0 }
 0x28f   :  { %v994_v33 = vpop.f32.mrb[9].mxu0 }
 0x290   :  { %v298_v34 = vpop.f32.mrb[10].mxu0 }
 0x291   :  { %v228_v35 = vpop.f32.mrb[4].mxu1  ;;  %v995_v36 = vpop.f32.mrb[11].mxu0 }
 0x292   :  { %v986_v37 = vpop.f32.mrb[5].mxu1 }
 0x293   :  { %v231_v38 = vpop.f32.mrb[6].mxu1  ;;  %v926_v37 = vld [vmem:[%s1278_s5 + $0x2] ss:$0 sm:$0xff] }
 0x294   :  { %v244_v39 = vpack.c.bf16 %v231_v38, %v228_v35  ;;  %v987_v40 = vpop.f32.mrb[7].mxu1 }
 0x296   :  { %1001 = vmatmul.mubr.msk.bf16.vlgmr.msra.gmra.mrb[8].mxu1 %vm257_vm4, %v244_v39 }
 0x297   :  { %1014 = vmatprep.mubr.msk.bf16.mxu1 %vm1088_vm0, %v1087_v1  ;;  %1011 = vmatpush3.bf16.msra.mxu1 %v1051_v41 }
 0x298   :  { %1012 = vmatprep.subr.bf16.mxu1 %v1087_v1 }
 0x29b   :  { %1013 = vmatpush3.bf16.msra.mxu1 %v1052_v42 }
 0x29c   :  { %1026 = vmatprep.subr.bf16.mxu1 %v1087_v1 }
 0x369   :  { %v351_v44 = vpop.f32.mrb[8].mxu1 }
 0x36a   :  { %v352_v45 = vadd.f32 %v351_v44, %v295_v32  ;;  %v1002_v46 = vpop.f32.mrb[9].mxu1 }
 0x36b   :  { %v354_v47 = vpop.f32.mrb[10].mxu1 }
 0x36c   :  { %v362_v48 = vadd.f32 %v918_v43, %v352_v45  ;;  %v355_v49 = vadd.f32 %v354_v47, %v298_v34  ;;  %v1003_v50 = vpop.f32.mrb[11].mxu1 }
 0x36e   :  { %v363_v51 = vadd.f32 %v918_v43, %v355_v49  ;;  %v364_v52 = vmax.f32 %v362_v48, 0.0 }
 0x370   :  { %v365_v53 = vmax.f32 %v363_v51, 0.0 }
 0x372   :  { %v366_v54 = vpack.c.bf16 %v365_v53, %v364_v52 }
 0x374   :  { %1005 = vmatpush3.bf16.msra.mxu0 %v366_v54  ;;  %1015 = vmatmul.mubr.msk.bf16.vlgmr.msra.gmra.mrb[12].mxu1 %vm257_vm4, %v366_v54 }
 0x375   :  { %1018 = vmatprep.subr.bf16.mxu0 %v1087_v1  ;;  %1030 = vmatprep.mubr.msk.bf16.mxu1 %vm1088_vm0, %v1087_v1 }
 0x376   :  { %1027 = vmatpush3.bf16.msra.mxu1 %v1055_v22 }
 0x377   :  { %1007 = vmatmul.mubr.msk.bf16.vlgmr.msra.gmra.mrb[12].mxu0 %vm40_vm1, %v1132_v2  ;;  %v564_v2 = vrot.slane %v538_v59, %v563_v0  ;;  %1028 = vmatprep.subr.bf16.mxu1 %v1087_v1 }
 0x378   :  { %1022 = vmatprep.mubr.msk.bf16.mxu0 %vm1088_vm0, %v1087_v1  ;;  %1019 = vmatpush3.bf16.msra.mxu0 %v1053_v55 }
 0x379   :  { %1020 = vmatprep.subr.bf16.mxu0 %v1087_v1  ;;  %566 = vbcast.lane.b32.xlu0 %v564_v2, 256 }
 0x37a   :  { %570 = vbcast.lane.b32.xlu1 %v564_v2, 264  ;;  %1029 = vmatpush3.bf16.msra.mxu1 %v1056_v23 }
 0x37c   :  { %1021 = vmatpush3.bf16.msra.mxu0 %v1054_v56 }
 0x37d   :  { %1034 = vmatprep.subr.bf16.mxu0 %v1087_v1  ;;  %577 = vbcast.lane.b32.xlu0 %v575_v4, 256 }
 0x37e   :  { %581 = vbcast.lane.b32.xlu1 %v575_v4, 264 }
 0x381   :  { %588 = vbcast.lane.b32.xlu0 %v586_v6, 256 }
 0x382   :  { %592 = vbcast.lane.b32.xlu1 %v586_v6, 264 }
 0x385   :  { %599 = vbcast.lane.b32.xlu0 %v597_v8, 256 }
 0x386   :  { %603 = vbcast.lane.b32.xlu1 %v597_v8, 264 }
 0x389   :  { %610 = vbcast.lane.b32.xlu0 %v608_v10, 256 }
 0x38a   :  { %614 = vbcast.lane.b32.xlu1 %v608_v10, 264 }
 0x38d   :  { %621 = vbcast.lane.b32.xlu0 %v619_v12, 256 }
 0x38e   :  { %625 = vbcast.lane.b32.xlu1 %v619_v12, 264 }
 0x3eb   :  { %v567_v28 = vpop.permute.xlu0 %566 }
 0x3ec   :  { %v571_v29 = vpop.permute.xlu1 %570 }
 0x3ef   :  { %v578_v30 = vpop.permute.xlu0 %577 }
 0x3f0   :  { %v582_v31 = vpop.permute.xlu1 %581 }
 0x3f3   :  { %v589_v32 = vpop.permute.xlu0 %588 }
 0x3f4   :  { %v593_v33 = vpop.permute.xlu1 %592 }
 0x3f7   :  { %v600_v34 = vpop.permute.xlu0 %599 }
 0x3f8   :  { %v604_v35 = vpop.permute.xlu1 %603 }
 0x3fb   :  { %v611_v36 = vpop.permute.xlu0 %610 }
 0x3fc   :  { %v615_v42 = vpop.permute.xlu1 %614 }
 0x3ff   :  { %v622_v48 = vpop.permute.xlu0 %621 }
 0x400   :  { %v626_v56 = vpop.permute.xlu1 %625 }
 0x447   :  { %v467_v13 = vpop.f32.mrb[12].mxu1 }
 0x448   :  { %v1016_v14 = vpop.f32.mrb[13].mxu1 }
 0x449   :  { %v470_v15 = vpop.f32.mrb[14].mxu1 }
 0x44a   :  { %v401_v16 = vpop.f32.mrb[12].mxu0  ;;  %v1017_v17 = vpop.f32.mrb[15].mxu1 }
 0x44b   :  { %v1008_v18 = vpop.f32.mrb[13].mxu0 }
 0x44c   :  { %v404_v19 = vpop.f32.mrb[14].mxu0 }
 0x44d   :  { %v417_v20 = vpack.c.bf16 %v404_v19, %v401_v16  ;;  %v1009_v21 = vpop.f32.mrb[15].mxu0 }
 0x44f   :  { %1023 = vmatmul.mubr.msk.bf16.vlgmr.msra.gmra.mrb[16].mxu0 %vm257_vm4, %v417_v20 }
 0x450   :  { %1038 = vmatprep.mubr.msk.bf16.mxu0 %vm1088_vm0, %v1087_v1 }
 0x522   :  { %v523_v38 = vpop.f32.mrb[16].mxu0 }
 0x523   :  { %v524_v39 = vadd.f32 %v523_v38, %v467_v13  ;;  %v1024_v40 = vpop.f32.mrb[17].mxu0 }
 0x524   :  { %v526_v41 = vpop.f32.mrb[18].mxu0 }
 0x525   :  { %v534_v43 = vadd.f32 %v926_v37, %v524_v39  ;;  %v527_v44 = vadd.f32 %v526_v41, %v470_v15  ;;  %v1025_v45 = vpop.f32.mrb[19].mxu0 }
 0x527   :  { %v536_v46 = vmax.f32 %v534_v43, 0.0  ;;  %v535_v47 = vadd.f32 %v926_v37, %v527_v44 }
 0x529   :  { %v627_v49 = vmul.f32 %v545_v24, %v536_v46  ;;  %v629_v50 = vmul.f32 %v556_v25, %v536_v46  ;;  %v631_v51 = vmul.f32 %v567_v28, %v536_v46  ;;  %v633_v52 = vmul.f32 %v578_v30, %v536_v46 }
 0x52a   :  { %v639_v53 = vmul.f32 %v611_v36, %v536_v46  ;;  %v537_v54 = vmax.f32 %v535_v47, 0.0  ;;  %v641_v55 = vmul.f32 %v622_v48, %v536_v46  ;;  %v635_v57 = vmul.f32 %v589_v32, %v536_v46 }
 0x52b   :  { %v643_v58 = vsel %vm257_vm4, %v627_v49, -inf  ;;  %v652_v59 = vsel %vm257_vm4, %v629_v50, -inf  ;;  %v637_v60 = vmul.f32 %v600_v34, %v536_v46  ;;  %v661_v61 = vsel %vm257_vm4, %v631_v51, -inf }
 0x52c   :  { %v697_v62 = vsel %vm257_vm4, %v639_v53, -inf  ;;  %v628_v63 = vmul.f32 %v549_v26, %v537_v54  ;;  %v630_v0 = vmul.f32 %v560_v27, %v537_v54  ;;  %v632_v2 = vmul.f32 %v571_v29, %v537_v54 }
 0x52d   :  { %v634_v3 = vmul.f32 %v582_v31, %v537_v54  ;;  %v640_v4 = vmul.f32 %v615_v42, %v537_v54  ;;  %v706_v5 = vsel %vm257_vm4, %v641_v55, -inf  ;;  %v642_v6 = vmul.f32 %v626_v56, %v537_v54 }
 0x52e   :  { %v644_v7 = vsel %vm257_vm4, %v628_v63, -inf  ;;  %v653_v8 = vsel %vm257_vm4, %v630_v0, -inf  ;;  %v636_v9 = vmul.f32 %v593_v33, %v537_v54  ;;  %v638_v10 = vmul.f32 %v604_v35, %v537_v54 }
 0x52f   :  { %v698_v11 = vsel %vm257_vm4, %v640_v4, -inf  ;;  %v707_v12 = vsel %vm257_vm4, %v642_v6, -inf  ;;  %v645_v13 = vmax.f32 %v643_v58, %v644_v7  ;;  %v654_v14 = vmax.f32 %v652_v59, %v653_v8 }
 0x530   :  { %v699_v15 = vmax.f32 %v697_v62, %v698_v11  ;;  %v708_v16 = vmax.f32 %v706_v5, %v707_v12  ;;  %v662_v17 = vsel %vm257_vm4, %v632_v2, -inf  ;;  %v670_v18 = vsel %vm257_vm4, %v633_v52, -inf }
 0x531   :  { %v646_v19 = vrot.slane %v645_v13, 4  ;;  %v655_v20 = vrot.slane %v654_v14, 4  ;;  %v663_v21 = vmax.f32 %v661_v61, %v662_v17  ;;  %v671_v22 = vsel %vm257_vm4, %v634_v3, -inf }
 0x532   :  { %v700_v23 = vrot.slane %v699_v15, 4  ;;  %v709_v24 = vrot.slane %v708_v16, 4  ;;  %v672_v25 = vmax.f32 %v670_v18, %v671_v22  ;;  %v679_v26 = vsel %vm257_vm4, %v635_v57, -inf }
 0x533   :  { %v647_v27 = vmax.f32 %v645_v13, %v646_v19  ;;  %v656_v28 = vmax.f32 %v654_v14, %v655_v20  ;;  %v664_v29 = vrot.slane %v663_v21, 4  ;;  %v680_v30 = vsel %vm257_vm4, %v636_v9, -inf }
 0x534   :  { %v701_v31 = vmax.f32 %v699_v15, %v700_v23  ;;  %v710_v32 = vmax.f32 %v708_v16, %v709_v24  ;;  %v673_v33 = vrot.slane %v672_v25, 4  ;;  %v681_v34 = vmax.f32 %v679_v26, %v680_v30 }
 0x535   :  { %v648_v35 = vrot.slane %v647_v27, 2  ;;  %v657_v36 = vrot.slane %v656_v28, 2  ;;  %v665_v37 = vmax.f32 %v663_v21, %v664_v29  ;;  %v689_v45 = vsel %vm257_vm4, %v638_v10, -inf }
 0x536   :  { %v702_v38 = vrot.slane %v701_v31, 2  ;;  %v711_v39 = vrot.slane %v710_v32, 2  ;;  %v674_v40 = vmax.f32 %v672_v25, %v673_v33  ;;  %v682_v41 = vrot.slane %v681_v34, 4 }
 0x537   :  { %v649_v42 = vmax.f32 %v647_v27, %v648_v35  ;;  %v658_v43 = vmax.f32 %v656_v28, %v657_v36  ;;  %v666_v44 = vrot.slane %v665_v37, 2  ;;  %v688_v48 = vsel %vm257_vm4, %v637_v60, -inf }
 0x538   :  { %v675_v46 = vrot.slane %v674_v40, 2  ;;  %v683_v47 = vmax.f32 %v681_v34, %v682_v41  ;;  %v690_v52 = vmax.f32 %v688_v48, %v689_v45  ;;  %v703_v53 = vmax.f32 %v701_v31, %v702_v38  ;;  %v1058_v38 = vld [vmem:[%s1277_s4 + $0x8] sm:$0xff]  }
 0x539   :  { %v650_v49 = vrot.slane %v649_v42, 1  ;;  %v659_v50 = vrot.slane %v658_v43, 1  ;;  %v667_v51 = vmax.f32 %v665_v37, %v666_v44  ;;  %v712_v54 = vmax.f32 %v710_v32, %v711_v39  ;;  %v1057_v37 = vld [vmem:[%s1277_s4] sm:$0xff]   ;;  %s1089_s4 = smov [#allocation2]  }
 0x53a   :  { %v676_v55 = vmax.f32 %v674_v40, %v675_v46  ;;  %v684_v56 = vrot.slane %v683_v47, 2  ;;  %v691_v61 = vrot.slane %v690_v52, 4  ;;  %v704_v60 = vrot.slane %v703_v53, 1  ;;  %1035 = vmatpush3.bf16.msra.mxu0 %v1057_v37  ;;  %v927_v39 = vld [vmem:[%s1278_s5 + $0x3] ss:$0 sm:$0xff]  ;;  %s897_s11 = sshll.u32 %s1089_s4, 4  ;;  %s898_s11 = int_to_ptr.vmem [resolvable:$true] %s897_s11 }
 0x53b   :  { %v651_v57 = vmax.f32 %v649_v42, %v650_v49  ;;  %v660_v58 = vmax.f32 %v658_v43, %v659_v50  ;;  %v668_v59 = vrot.slane %v667_v51, 1  ;;  %v713_v5 = vrot.slane %v712_v54, 1  ;;  %1036 = vmatprep.subr.bf16.mxu0 %v1087_v1  ;;  %v931_v1 = vld [vmem:[%s1278_s5 + $0x4] ss:$0 sm:$0xff]  ;;  %s1063_s12 = scalar_lea.vmem %s898_s11, 128  ;;  %p1068_p1 = scmp.lt.s32.totalorder %s898_s11, %s898_s11 }
 0x53c   :  { %v677_v62 = vrot.slane %v676_v55, 1  ;;  %v685_v63 = vmax.f32 %v683_v47, %v684_v56  ;;  %v692_v2 = vmax.f32 %v690_v52, %v691_v61  ;;  %v705_v17 = vmax.f32 %v703_v53, %v704_v60  ;;  %p1064_p0 = scmp.ne.s32.totalorder %s898_s11, %s1063_s12  ;;  %p1069_p2 = scmp.lt.s32.totalorder %s1063_s12, %s1063_s12 }
 0x53d   :  { %v669_v0 = vmax.f32 %v667_v51, %v668_v59  ;;  %v719_v3 = vpack.c.bf16 %v651_v57, %v651_v57  ;;  %v720_v4 = vpack.c.bf16 %v660_v58, %v660_v58  ;;  %v714_v20 = vmax.f32 %v712_v54, %v713_v5 }
 0x53e   :  { %v678_v6 = vmax.f32 %v676_v55, %v677_v62  ;;  %v686_v7 = vrot.slane %v685_v63, 1  ;;  %v693_v8 = vrot.slane %v692_v2, 2  ;;  %v725_v26 = vpack.c.bf16 %v705_v17, %v705_v17  ;;  %1037 = vmatpush3.bf16.msra.mxu0 %v1058_v38  ;;  %p1070_p3 = por %p1069_p2, %p1068_p1 }
 0x53f   :  { %v721_v9 = vpack.c.bf16 %v669_v0, %v669_v0  ;;  %v740_v10 = vunpack.c.l.b16 %v719_v3  ;;  %v741_v11 = vunpack.c.l.b16 %v720_v4  ;;  %v726_v28 = vpack.c.bf16 %v714_v20, %v714_v20 }
 0x540   :  { %v687_v12 = vmax.f32 %v685_v63, %v686_v7  ;;  %v722_v13 = vpack.c.bf16 %v678_v6, %v678_v6  ;;  %v694_v14 = vmax.f32 %v692_v2, %v693_v8  ;;  %v746_v31 = vunpack.c.l.b16 %v725_v26  ;;  %p1071_p4 = pnand %p1070_p3, %p1064_p0 }
 0x541   :  { %v742_v15 = vunpack.c.l.b16 %v721_v9  ;;  %v749_v16 = vsel %vm748_vm5, %v741_v11, %v740_v10  ;;  %v747_v32 = vunpack.c.l.b16 %v726_v28 }
 0x542   :  { %v723_v18 = vpack.c.bf16 %v687_v12, %v687_v12  ;;  %v743_v19 = vunpack.c.l.b16 %v722_v13  ;;  %v695_v21 = vrot.slane %v694_v14, 1 }
 0x543   :  { %v751_v22 = vsel %vm750_vm6, %v742_v15, %v749_v16 }
 0x544   :  { %v744_v23 = vunpack.c.l.b16 %v723_v18  ;;  %v753_v24 = vsel %vm752_vm7, %v743_v19, %v751_v22  ;;  %v696_v25 = vmax.f32 %v694_v14, %v695_v21 }
 0x546   :  { %v755_v27 = vsel %vm754_vm8, %v744_v23, %v753_v24  ;;  %v724_v29 = vpack.c.bf16 %v696_v25, %v696_v25 }
 0x548   :  { %v745_v30 = vunpack.c.l.b16 %v724_v29 }
 0x54a   :  { %v757_v33 = vsel %vm756_vm9, %v745_v30, %v755_v27 }
 0x54b   :  { %v759_v34 = vsel %vm758_vm10, %v746_v31, %v757_v33 }
 0x54c   :  { %v761_v35 = vsel %vm760_vm11, %v747_v32, %v759_v34 }
 0x54d   :  { %v762_v36 = vpack.c.b16 %v761_v35, %v761_v35 }
 0x54f   :  { %1031 = vmatmul.mubr.msk.bf16.vlgmr.msra.gmra.mrb[16].mxu1 %vm257_vm4, %v762_v36 }
 0x622   :  { %v812_v40 = vpop.f32.mrb[16].mxu1 }
 0x623   :  { %v813_v41 = vadd.f32 %v927_v39, %v812_v40  ;;  %v1032_v42 = vpop.f32.mrb[17].mxu1 }
 0x624   :  { %v815_v43 = vpop.f32.mrb[18].mxu1 }
 0x625   :  { %v818_v44 = vmax.f32 %v813_v41, 0.0  ;;  %v1033_v45 = vpop.f32.mrb[19].mxu1 }
 0x627   :  { %v819_v46 = vpack.c.bf16 %v818_v44, %v818_v44 }
 0x629   :  { %1039 = vmatmul.mubr.msk.bf16.vlgmr.msra.gmra.mrb[20].mxu0 %vm257_vm4, %v819_v46 }
 0x6fc   :  { %v878_v47 = vpop.f32.mrb[20].mxu0 }
 0x6fd   :  { %v879_v48 = vadd.f32 %v931_v1, %v878_v47  ;;  %v1040_v49 = vpop.f32.mrb[21].mxu0 }
 0x6fe   :  { %v881_v50 = vpop.f32.mrb[22].mxu0 }
 0x6ff   :  { %v935_v51 = vmul.f32 -1.442695, %v879_v48  ;;  %v1041_v52 = vpop.f32.mrb[23].mxu0 }
 0x701   :  { %1059 = vpow2.f32 %v935_v51 }
 0x70b   :  { %v1060_v53 = vpop.eup %1059 }
 0x70c   :  { %v887_v54 = vadd.f32 1.0, %v1060_v53 }
 0x70e   :  { %1061 = vrcp.f32 %v887_v54 }
 0x718   :  { %v1062_v55 = vpop.eup %1061 }
 0x719   :  { %890 = vst [vmem:[#allocation2] sm:$0xff] %v1062_v55 }
 0x71a   :  { %1074 = shalt.err (!%p1071_p4)
}
 0x71b   :  { %s1075_s14 = scalar_lea.hbm %s1279_s6, 128 }
 0x71c   :  { %p1076_p5 = scmp.ne.s32.totalorder %s1279_s6, %s1075_s14  ;;  %p1079_p6 = scmp.lt.u32.totalorder %s1075_s14, %s1279_s6 }
 0x71e   :  { %p1081_p7 = pnand %p1079_p6, %p1076_p5 }
 0x720   :  { %1084 = shalt.err (!%p1081_p7)
}
 0x721   :  { %900 = dma.vmem_to_hbm [thread:$0]  %s898_s11, 128, %s1279_s6, [#allocation3]  }
 0x722   :  { %1085 = dma.done.wait [#allocation3], 128  }
 0x723   :  { %1086 = vsyncadd [#allocation3], 4294967168 }
 0x724   :  { %904 = vsyncpa [#allocation3], 1 }

</bundles_post_ra>
